<compile_context>
chip_gen: v6e
topology: v6e:2x2x1
jax: 0.10.0
libtpu: 0.0.40
codegen_flags: <defaults>
</compile_context>

<pallas_src>
import functools
import math

import jax
import jax.numpy as jnp
import numpy as np
from jax.experimental import pallas as pl
from jax.experimental.pallas import tpu as pltpu


_VMEM_WORKING_SET_BUDGET = 20 * 1024 * 1024   # double-buffered inputs + intermediates
_VMEM_LIMIT_BYTES = 32 * 1024 * 1024          # explicit scoped-VMEM limit (v5e/v6e/v7x safe)
_MAX_TILE_L = 128 * 1024


def _round_up(x: int, m: int) -> int:
    return int(math.ceil(x / m) * m)


def _focal_pow(d, gamma: float):
    """(1 - p)^gamma, specialised for small integer gamma (no EUP pow)."""
    g = float(gamma)
    if g == 0.0:
        return jnp.ones_like(d)
    if g.is_integer() and 0 < g <= 8:
        out = d
        for _ in range(int(g) - 1):
            out = out * d
        return out
    return jnp.power(d, g)


def _pick_tile_l(num_classes: int, logit_itemsize: int, requested, length: int) -> int:
    """Largest 128-multiple spatial tile that keeps the VMEM working set in budget."""
    pack = max(1, 4 // int(logit_itemsize))       # sublane packing: 1 for f32, 2 for bf16
    sub = 8 * pack                                # minimal sublane extent for that dtype
    c_in = _round_up(num_classes, sub)            # padded class rows of the logits block
    c_f32 = _round_up(num_classes, 8)             # padded rows of f32 intermediates
    per_col_bytes = (
        2 * c_in * int(logit_itemsize)            # logits block, double buffered
        + 2 * 8 * 4                               # int32 labels block (pads to 8 sublanes), x2
        + 6 * c_f32 * 4                           # live full-C f32 intermediates (estimate)
        + 6 * 8 * 4                               # live (1, tile) row intermediates (estimate)
    )
    tile = (_VMEM_WORKING_SET_BUDGET // per_col_bytes) // 128 * 128
    tile = max(128, min(tile, _MAX_TILE_L))
    if requested is not None:
        tile = min(tile, max(128, _round_up(int(requested), 128)))
    tile = min(tile, max(128, _round_up(length, 128)))
    return tile


def _focal_loss_kernel(logits_ref, labels_ref, out_ref, *, gamma: float,
                       ignore_lb: int, denom_via_mxu: bool):
    x = logits_ref[0].astype(jnp.float32)           # (C, TILE_L): classes on sublanes
    labels = labels_ref[0]                          # (1, TILE_L) int32

    # Numerically stable softmax pieces over the class (sublane) axis.
    m = jnp.max(x, axis=0, keepdims=True)           # (1, TILE_L)
    shifted = x - m
    e = jnp.exp(shifted)                            # EUP
    if denom_via_mxu:
        # Offload one class-axis reduce to the otherwise idle MXU (profile-gated;
        # frees XLU on v6e/v7x).  f32 operands, f32 accumulation.
        ones = jnp.ones((1, x.shape[0]), jnp.float32)
        denom = jnp.dot(ones, e, preferred_element_type=jnp.float32)
    else:
        denom = jnp.sum(e, axis=0, keepdims=True)   # (1, TILE_L)

    # Shifted logit of the picked class via one-hot select + sublane reduce.
    cls_ids = jax.lax.broadcasted_iota(jnp.int32, x.shape, 0)
    x_y = jnp.sum(jnp.where(cls_ids == labels, shifted, 0.0),
                  axis=0, keepdims=True)            # (1, TILE_L)

    # Focal-weighted NLL, computed only at the picked class.
    log_p_y = x_y - jnp.log(denom)                  # log_softmax[label]
    factor = _focal_pow(1.0 - jnp.exp(log_p_y), gamma)
    valid = labels != ignore_lb
    tile_sum = jnp.sum(jnp.where(valid, factor * log_p_y, 0.0))

    # Lane-dense (8, 128) slab store of the per-tile partial; negation folded in.
    out_ref[...] = jnp.broadcast_to(-tile_sum, out_ref.shape)


def softmax_focal_loss(logits, labels, *, gamma=2.0, ignore_lb=255,
                       tile_l=None, denom_via_mxu=False):
    """logits: (N, C, H, W) f32/bf16; labels: (N, H, W) int. Returns scalar mean loss."""
    N, C, H, W = logits.shape
    L = H * W

    # Free reshapes (no transpose): spatial on lanes, classes on sublanes.
    x = logits.reshape(N, C, L)                     # keep input dtype (bf16 ok)
    y = labels.reshape(N, 1, L).astype(jnp.int32)

    tile = _pick_tile_l(C, jnp.dtype(x.dtype).itemsize, tile_l, L)

    Lp = _round_up(L, tile)
    if Lp != L:
        # Padded columns are labelled ignore_lb -> contribute nothing.
        x = jnp.pad(x, ((0, 0), (0, 0), (0, Lp - L)))
        y = jnp.pad(y, ((0, 0), (0, 0), (0, Lp - L)), constant_values=ignore_lb)

    num_tiles = Lp // tile
    grid = (N, num_tiles)
    kernel = functools.partial(_focal_loss_kernel, gamma=float(gamma),
                               ignore_lb=int(ignore_lb),
                               denom_via_mxu=bool(denom_via_mxu))

    # Per-tile partials stored as lane-dense (8,128) slabs: output row block
    # [8*l, 8*l+8) belongs to spatial tile l; only element [n, 8*l, 0] is read.
    partials = pl.pallas_call(
        kernel,
        out_shape=jax.ShapeDtypeStruct((N, num_tiles * 8, 128), jnp.float32),
        grid_spec=pltpu.PrefetchScalarGridSpec(
            num_scalar_prefetch=0,
            grid=grid,
            in_specs=[
                pl.BlockSpec((1, C, tile), lambda n, l: (n, 0, l)),
                pl.BlockSpec((1, 1, tile), lambda n, l: (n, 0, l)),
            ],
            out_specs=pl.BlockSpec((1, 8, 128), lambda n, l: (n, l, 0)),
        ),
        compiler_params=pltpu.CompilerParams(
            dimension_semantics=("parallel", "parallel"),
            vmem_limit_bytes=_VMEM_LIMIT_BYTES),
    )(x, y)

    # Final reduction + mean over non-ignored pixels in plain XLA (matches
    # nn.NLLLoss default reduction; all-ignored batches yield NaN like PyTorch).
    loss_sum = jnp.sum(partials[:, ::8, 0])
    valid_cnt = jnp.sum((labels != ignore_lb).astype(jnp.float32))
    return loss_sum / valid_cnt


def _reference(logits, labels, gamma, ignore_lb):
    scores = jax.nn.softmax(logits, axis=1)
    factor = jnp.power(1.0 - scores, gamma)
    log_score = factor * jax.nn.log_softmax(logits, axis=1)
    onehot = jax.nn.one_hot(labels, logits.shape[1], axis=1, dtype=log_score.dtype)
    picked = jnp.sum(onehot * log_score, axis=1)
    valid = labels != ignore_lb
    return jnp.sum(jnp.where(valid, -picked, 0.0)) / jnp.sum(valid.astype(jnp.float32))


if __name__ == "__main__":
    key = jax.random.PRNGKey(0)
    N, C, H, W = 2, 4, 16, 16
    gamma = 2.0
    ignore_lb = 255

    k1, k2, k3 = jax.random.split(key, 3)
    logits = jax.random.normal(k1, (N, C, H, W), dtype=jnp.float32)
    labels = jax.random.randint(k2, (N, H, W), 0, C, dtype=jnp.int32)
    # Sprinkle in some ignored pixels to exercise ignore_index=255.
    ignore_mask = jax.random.bernoulli(k3, 0.1, (N, H, W))
    labels = jnp.where(ignore_mask, ignore_lb, labels)

    ref = _reference(logits, labels, gamma, ignore_lb)

    # Default (budget-driven) tiling: single spatial tile at this small shape.
    loss = jax.block_until_ready(
        softmax_focal_loss(logits, labels, gamma=gamma, ignore_lb=ignore_lb))
    np.testing.assert_allclose(np.asarray(loss), np.asarray(ref),
                               rtol=1e-4, atol=1e-5)

    # Small tile: exercises the multi-tile, per-tile-partial-output path.
    loss_small = jax.block_until_ready(
        softmax_focal_loss(logits, labels, gamma=gamma, ignore_lb=ignore_lb,
                           tile_l=128))
    np.testing.assert_allclose(np.asarray(loss_small), np.asarray(ref),
                               rtol=1e-4, atol=1e-5)

    # bf16 logits path (halves HBM traffic in the large-C regime); compare
    # against the reference evaluated on the same bf16-rounded inputs.
    logits_bf16 = logits.astype(jnp.bfloat16)
    ref_bf16 = _reference(logits_bf16.astype(jnp.float32), labels, gamma, ignore_lb)
    loss_bf16 = jax.block_until_ready(
        softmax_focal_loss(logits_bf16, labels, gamma=gamma, ignore_lb=ignore_lb))
    np.testing.assert_allclose(np.asarray(loss_bf16), np.asarray(ref_bf16),
                               rtol=1e-3, atol=1e-3)

    print("KERNEL_OK")
</pallas_src>

<mosaic_0001>
module attributes {stable_mosaic.version = 11 : i64} {
  func.func @_focal_loss_kernel(%arg0: i32, %arg1: i32, %arg2: memref<1x4x256xf32, #tpu.memory_space<vmem>>, %arg3: memref<1x1x256xi32, #tpu.memory_space<vmem>>, %arg4: memref<1x8x128xf32, #tpu.memory_space<vmem>>) attributes {dimension_semantics = [#tpu.dimension_semantics<parallel>, #tpu.dimension_semantics<parallel>], iteration_bounds = array<i64: 2, 1>, scalar_prefetch = 0 : i64, scratch_operands = 0 : i64, tpu.core_type = #tpu.core_type<tc>, window_params = [{transform_indices = @transform_0, window_bounds = array<i64: 1, 4, 256>}, {transform_indices = @transform_1, window_bounds = array<i64: 1, 1, 256>}, {transform_indices = @transform_2, window_bounds = array<i64: 1, 8, 128>}]} {
    %c0 = arith.constant 0 : index
    %c0_0 = arith.constant 0 : index
    %c0_1 = arith.constant 0 : index
    %0 = vector.load %arg2[%c0, %c0_0, %c0_1] : memref<1x4x256xf32, #tpu.memory_space<vmem>>, vector<1x4x256xf32>
    %1 = vector.shape_cast %0 : vector<1x4x256xf32> to vector<4x256xf32>
    %c0_2 = arith.constant 0 : index
    %c0_3 = arith.constant 0 : index
    %c0_4 = arith.constant 0 : index
    %2 = vector.load %arg3[%c0_2, %c0_3, %c0_4] : memref<1x1x256xi32, #tpu.memory_space<vmem>>, vector<1x1x256xi32>
    %3 = vector.shape_cast %2 : vector<1x1x256xi32> to vector<1x256xi32>
    %cst = arith.constant dense<0xFF800000> : vector<256xf32>
    %4 = vector.multi_reduction <maximumf>, %1, %cst [0] : vector<4x256xf32> to vector<256xf32>
    %5 = vector.shape_cast %4 : vector<256xf32> to vector<1x256xf32>
    %6 = vector.broadcast %5 : vector<1x256xf32> to vector<4x256xf32>
    %7 = arith.subf %1, %6 : vector<4x256xf32>
    %8 = math.exp %7 : vector<4x256xf32>
    %cst_5 = arith.constant dense<0.000000e+00> : vector<256xf32>
    %9 = vector.multi_reduction <add>, %8, %cst_5 [0] : vector<4x256xf32> to vector<256xf32>
    %10 = vector.shape_cast %9 : vector<256xf32> to vector<1x256xf32>
    %11 = tpu.iota {dimensions = array<i32: 0>} : vector<4x256xi32>
    %12 = vector.broadcast %3 : vector<1x256xi32> to vector<4x256xi32>
    %13 = arith.cmpi eq, %11, %12 : vector<4x256xi32>
    %cst_6 = arith.constant 0.000000e+00 : f32
    %14 = vector.broadcast %cst_6 : f32 to vector<4x256xf32>
    %15 = arith.select %13, %7, %14 : vector<4x256xi1>, vector<4x256xf32>
    %cst_7 = arith.constant dense<0.000000e+00> : vector<256xf32>
    %16 = vector.multi_reduction <add>, %15, %cst_7 [0] : vector<4x256xf32> to vector<256xf32>
    %17 = vector.shape_cast %16 : vector<256xf32> to vector<1x256xf32>
    %18 = math.log %10 : vector<1x256xf32>
    %19 = arith.subf %17, %18 : vector<1x256xf32>
    %20 = math.exp %19 : vector<1x256xf32>
    %cst_8 = arith.constant 1.000000e+00 : f32
    %21 = vector.broadcast %cst_8 : f32 to vector<1x256xf32>
    %22 = arith.subf %21, %20 : vector<1x256xf32>
    %23 = arith.mulf %22, %22 : vector<1x256xf32>
    %c255_i32 = arith.constant 255 : i32
    %24 = vector.broadcast %c255_i32 : i32 to vector<1x256xi32>
    %25 = arith.cmpi ne, %3, %24 : vector<1x256xi32>
    %26 = arith.mulf %23, %19 : vector<1x256xf32>
    %cst_9 = arith.constant 0.000000e+00 : f32
    %27 = vector.broadcast %cst_9 : f32 to vector<1x256xf32>
    %28 = arith.select %25, %26, %27 : vector<1x256xi1>, vector<1x256xf32>
    %29 = vector.shape_cast %28 : vector<1x256xf32> to vector<1x1x256xf32>
    %cst_10 = arith.constant dense<0.000000e+00> : vector<1xf32>
    %30 = vector.multi_reduction <add>, %29, %cst_10 [1, 2] : vector<1x1x256xf32> to vector<1xf32>
    %31 = vector.shape_cast %30 : vector<1xf32> to vector<1x1x1xf32>
    %32 = vector.extract %31[0, 0, 0] : f32 from vector<1x1x1xf32>
    %cst_11 = arith.constant 0.000000e+00 : f32
    %33 = arith.subf %cst_11, %32 : f32
    %34 = vector.broadcast %33 : f32 to vector<1x8x128xf32>
    %c0_12 = arith.constant 0 : index
    %c0_13 = arith.constant 0 : index
    %c0_14 = arith.constant 0 : index
    %35 = vector.load %arg4[%c0_12, %c0_13, %c0_14] : memref<1x8x128xf32, #tpu.memory_space<vmem>>, vector<1x8x128xf32>
    tpu.vector_store %arg4[%c0_12, %c0_13, %c0_14], %34 {strides = array<i32>} : memref<1x8x128xf32, #tpu.memory_space<vmem>>, vector<1x8x128xf32>,
    return
  }
  func.func @transform_0(%arg0: i32, %arg1: i32) -> (i32, i32, i32) {
    %c0_i32 = arith.constant 0 : i32
    %c0_i32_0 = arith.constant 0 : i32
    return %arg0, %c0_i32, %arg1 : i32, i32, i32
  }
  func.func @transform_1(%arg0: i32, %arg1: i32) -> (i32, i32, i32) {
    %c0_i32 = arith.constant 0 : i32
    %c0_i32_0 = arith.constant 0 : i32
    return %arg0, %c0_i32, %arg1 : i32, i32, i32
  }
  func.func @transform_2(%arg0: i32, %arg1: i32) -> (i32, i32, i32) {
    %c0_i32 = arith.constant 0 : i32
    %c0_i32_0 = arith.constant 0 : i32
    return %arg0, %arg1, %c0_i32 : i32, i32, i32
  }
}

</mosaic_0001>

<bundles_post_ra>
// kernel: tpu_custom_call.1
= control target key start
LH: loop header
LB: loop body
LE: loop exit
PB: predicated region body
PF: predicated region fallthrough
CT: control target
= control target key end

     0   :  { %7 = vsyncpa [#allocation3], 0  ;;  %s945_s0 = inlined_call_operand.hbm [shape: f32[2,4,256], index: 0, kind: input, shape index: {}]   ;;  %s946_s1 = inlined_call_operand.hbm [shape: s32[2,1,256], index: 1, kind: input, shape index: {}]   ;;  %s947_s2 = inlined_call_operand.hbm [shape: f32[2,8,128], index: 2, kind: output, shape index: {}]  }
   0x1   :  { %9 = vsyncpa [#allocation3 + $0x1], 0 }
   0x2   :  { %10 = vsyncpa [#allocation6], 0 }
   0x3   :  { %12 = vsyncpa [#allocation6 + $0x1], 0 }
   0x4   :  { %13 = vsyncpa [#allocation4], 0 }
   0x5   :  { %15 = vsyncpa [#allocation4 + $0x1], 0  ;;  %s745_s9 = smov 0   ;;  %s747_s10 = smov 0  }
   0x6   :  { %s749_s11 = smov 0   ;;  %s751_s12 = smov 0  }
   0x7   :  { %s753_s13 = smov 0   ;;  %s755_s14 = smov 0  }
   0x8 LB: > { %s483_s15 = sadd.s32 4294967295, %s724_s14   ;;  %s484_s16 = sadd.s32 4294967294, %s724_s14   ;;  %s724_s14 = sphi %s755_s14, %s21_s14   ;;  %s720_s13 = sphi %s753_s13, %s959_s13   ;;  %s716_s12 = sphi %s751_s12, %s958_s12   ;;  %s712_s11 = sphi %s749_s11, %s957_s11   ;;  %s708_s10 = sphi %s747_s10, %s956_s10   ;;  %s704_s9 = sphi %s745_s9, %s955_s9  }
   0x9   : > { %s33_s17 = sadd.s32 1, %s720_s13  ;;  %s42_s18 = sadd.s32 1, %s712_s11 }
   0xa   : > { %p35_p0 = scmp.ge.s32.totalorder %s33_s17, 2  ;;  %p49_p1 = scmp.ne.s32.totalorder %s712_s11, %s708_s10 }
   0xb   : > { %p50_p2 = scmp.eq.s32.totalorder %s724_s14, 0  ;;  %p55_p3 = scmp.ne.s32.totalorder %s708_s10, %s704_s9 }
   0xc   : > { %s961_s17 = smov (%p35_p0, %s33_s17), 0  ;;  %p56_p5 = scmp.eq.s32.totalorder %s483_s15, 0 }
   0xd   : > { %p786_p4 = por %p50_p2, %p49_p1  ;;  %s37_s20 = ssub.s32 %s720_s13, %s961_s17 }
   0xe   : > { %p109_p6 = scmp.eq.s32.totalorder %s483_s15, 1  ;;  %p40_p7 = scmp.eq.s32.totalorder %s37_s20, 0 }
   0xf   : > { %p792_p8 = por %p56_p5, %p55_p3  ;;  %p115_p10 = scmp.eq.s32.totalorder %s484_s16, 1 }
  0x10   : > { %p796_p9 = por %p109_p6, %p49_p1  ;;  %p522_p13 = scmp.lt.s32.totalorder %s724_s14, 2 }
  0x11   : > { %s801_s23 = scalar_select %p40_p7, %s712_s11, %s42_s18  }
  0x12   : > { %p803_p11 = por %p115_p10, %p55_p3  ;;  %s810_s25 = sand.u32 1, %s712_s11  }
  0x13   : > { %s487_s26 = sshll.u32 %s810_s25, 3  ;;  %s501_s27 = sshll.u32 %s720_s13, 7 }
  0x14   : > { %s147_s30 = scalar_lea.hbm %s945_s0, %s501_s27  ;;  %s139_s3 = scalar_lea.vmem [#allocation2], %s487_s26 }
  0x15   : > { %s149_s4 = sshll.u32 %s139_s3, 4  ;;  %p819_p0 = pnand %p522_p13, %p786_p4  ;;  %s150_s4 = int_to_ptr.vmem [resolvable:$true] %s149_s4 }
  0x16   : > { %p493_p1 = scmp.ge.s32.totalorder %s724_s14, 1  ;;  %p175_p2 = scmp.lt.s32.totalorder %s724_s14, 3 }
  0x17   : > { %s136_s6 = scalar_lea.sflag [#allocation3], %s810_s25  ;;  %p586_p3 = pneg %p819_p0 }
  0x18   : > { %s597_s7 = scalar_lea.vmem %s150_s4, 128  ;;  %s726_s8 = smov [#allocation2]  }
  0x19   : > { %p598_p5 = scmp.ne.s32.totalorder %s150_s4, %s597_s7  ;;  %s602_s15 = sshll.u32 %s726_s8, 4  ;;  %s603_s15 = int_to_ptr.vmem [resolvable:$false] %s602_s15 }
  0x1a   : > { %s604_s16 = scalar_lea.vmem %s603_s15, 256  ;;  %p605_p4 = scmp.lt.s32.totalorder %s150_s4, %s603_s15 }
  0x1b   : > { %p600_p6 = pnand %p598_p5, %p586_p3  ;;  %p606_p10 = scmp.lt.s32.totalorder %s604_s16, %s597_s7 }
  0x1d   : > { %p601_p7 = pneg %p600_p6  ;;  %p607_p13 = por %p606_p10, %p605_p4 }
  0x1f   : > { %p608_p12 = pnand %p607_p13, %p601_p7 }
  0x21   : > { %611 = shalt.err (!%p608_p12)
}
  0x22   : > { %514 = dma.hbm_to_vmem [thread:$0]  (!%p819_p0), %s147_s30, 128, %s150_s4, %s136_s6  }
  0x23   : > { %p837_p5 = pnand %p493_p1, %p175_p2  ;;  %s490_s19 = sshll.u32 %s810_s25, 1 }
  0x24   : > { %s502_s20 = sshll.u32 %s720_s13, 5  ;;  %s160_s29 = scalar_lea.vmem [#allocation5], %s490_s19 }
  0x25   : > { %s168_s28 = scalar_lea.hbm %s946_s1, %s502_s20  ;;  %s170_s3 = sshll.u32 %s160_s29, 4  ;;  %s171_s3 = int_to_ptr.vmem [resolvable:$true] %s170_s3 }
  0x26   : > { %s157_s7 = scalar_lea.sflag [#allocation6], %s810_s25  ;;  %s625_s8 = scalar_lea.vmem %s171_s3, 32 }
  0x27   : > { %p626_p12 = scmp.ne.s32.totalorder %s171_s3, %s625_s8  ;;  %s727_s30 = smov [#allocation5]  }
  0x28   : > { %s630_s4 = sshll.u32 %s727_s30, 4  ;;  %s631_s4 = int_to_ptr.vmem [resolvable:$false] %s630_s4 }
  0x29   : > { %p628_p6 = pnand %p626_p12, %p586_p3  ;;  %s632_s6 = scalar_lea.vmem %s631_s4, 64 }
  0x2a   : > { %p633_p1 = scmp.lt.s32.totalorder %s171_s3, %s631_s4  ;;  %p634_p2 = scmp.lt.s32.totalorder %s632_s6, %s625_s8 }
  0x2b   : > { %p629_p7 = pneg %p628_p6 }
  0x2c   : > { %p635_p4 = por %p634_p2, %p633_p1 }
  0x2e   : > { %p636_p10 = pnand %p635_p4, %p629_p7 }
  0x30   : > { %639 = shalt.err (!%p636_p10)
}
  0x31   : > { %517 = dma.hbm_to_vmem [thread:$0]  (!%p819_p0), %s168_s28, 32, %s171_s3, %s157_s7  }
  0x32   : > { %179 = sbr.rel (%p837_p5) target bundleno = 378 (0x17a), region = 28  ;;  %s855_s25 = sand.u32 (!%p837_p5), 1, %s708_s10  }
  0x33   : > { %s494_s15 = sshll.u32 (!%p837_p5), %s855_s25, 3  ;;  %s182_s16 = scalar_lea.sflag (!%p837_p5), [#allocation3], %s855_s25 }
  0x34   : > { %s185_s19 = scalar_lea.vmem (!%p837_p5), [#allocation2], %s494_s15 }
  0x37   : > { %691 = dma.done.wait (%p792_p8), %s182_s16, 128  }
  0x38   : > { %693 = vsyncadd (%p792_p8), %s182_s16, 4294967168  ;;  %s495_s5 = sshll.u32 %s855_s25, 1  ;;  %s191_s18 = scalar_lea.sflag [#allocation6], %s855_s25 }
  0x39   : > { %s194_s20 = scalar_lea.vmem [#allocation5], %s495_s5 }
  0x3a   : > { %695 = dma.done.wait (%p792_p8), %s191_s18, 32  }
  0x3b   : > { %697 = vsyncadd (%p792_p8), %s191_s18, 4294967264  ;;  %vm227_vm0 = vcmask 1043456   ;;  %v222_v0 = vld [vmem:[%s185_s19] sm:$0xff]  ;;  %v266_v17 = vlaneseq  ;;  %v876_v22 = vld [vmem:[%s194_s20] sm:$0x3]  ;;  %vm344_vm4 = vcmask 1040384  }
  0x3c   : > { %v225_v1 = vcombine.high %v222_v0, %v222_v0  ;;  %v228_v2 = vsel %vm227_vm0, %v222_v0, -inf  ;;  %vm311_vm3 = vcmp.ne.s32.totalorder %v876_v22, 255  ;;  %s219_s21 = scalar_lea.vmem [#allocation7], %s494_s15  ;;  %s498_s27 = sshll.u32 %s716_s12, 7 }
  0x3d   : > { %v229_v3 = vrot.slane %v228_v2, 4  ;;  %v873_v20 = vshrl.u32 %v266_v17, 7  ;;  %s375_s26 = sshll.u32 %s219_s21, 4  ;;  %s903_s8 = scalar_lea.hbm %s947_s2, %s498_s27  ;;  %s376_s26 = int_to_ptr.vmem [resolvable:$true] %s375_s26 }
  0x3e   : > { %v235_v4 = vsel %vm227_vm0, %v225_v1, -inf  ;;  %s361_s30 = scalar_lea.sflag [#allocation4], %s855_s25  ;;  %s640_s4 = scalar_lea.vmem %s376_s26, 128 }
  0x3f   : > { %v230_v5 = vmax.f32 %v228_v2, %v229_v3  ;;  %v236_v6 = vrot.slane %v235_v4, 4  ;;  %v270_v21 = vsub.s32 0, %v873_v20  ;;  %v274_v23 = vsub.s32 1, %v873_v20  ;;  %p641_p8 = scmp.ne.s32.totalorder %s376_s26, %s640_s4  ;;  %s729_s6 = smov [#allocation7]  }
  0x40   : > { %v728_v3 = vmov 1966171168   ;;  %s644_s15 = sshll.u32 %s729_s6, 4  ;;  %s645_s15 = int_to_ptr.vmem [resolvable:$false] %s644_s15 }
  0x41   : > { %v231_v7 = vrot.slane %v230_v5, 2  ;;  %v237_v8 = vmax.f32 %v235_v4, %v236_v6  ;;  %v271_v24 = vrot.slane %v876_v22, %v270_v21  ;;  %v275_v25 = vrot.slane %v876_v22, %v274_v23  ;;  %p642_p0 = pnand %p641_p8, %p796_p9  ;;  %s646_s12 = scalar_lea.vmem %s645_s15, 256 }
  0x42   : > { %v318_v4 = vunpack.c.l.s4 %v728_v3  ;;  %p647_p13 = scmp.lt.s32.totalorder %s376_s26, %s645_s15  ;;  %p648_p5 = scmp.lt.s32.totalorder %s646_s12, %s640_s4 }
  0x43   : > { %v232_v9 = vmax.f32 %v230_v5, %v231_v7  ;;  %v238_v10 = vrot.slane %v237_v8, 2  ;;  %vm276_vm1 = vcmp.eq.s32.totalorder %v873_v20, %v271_v24  ;;  %vm277_vm2 = vcmp.eq.s32.totalorder %v873_v20, %v275_v25  ;;  %p643_p3 = pneg %p642_p0 }
  0x44   : > { %p649_p12 = por %p648_p5, %p647_p13 }
  0x45   : > { %v233_v11 = vrot.slane %v232_v9, 1  ;;  %v239_v12 = vmax.f32 %v237_v8, %v238_v10  ;;  %v319_v10 = vunpack.c.0.s8 %v318_v4 }
  0x46   : > { %p650_p6 = pnand %p649_p12, %p643_p3 }
  0x47   : > { %v234_v13 = vmax.f32 %v232_v9, %v233_v11  ;;  %v240_v14 = vrot.slane %v239_v12, 1 }
  0x49   : > { %v241_v15 = vmax.f32 %v239_v12, %v240_v14  ;;  %v322_v14 = vsub.s32 %v319_v10, %v873_v20 }
  0x4b   : > { %v244_v16 = vcombine.low %v234_v13, %v241_v15 }
  0x4d   : > { %v246_v18 = vsub.f32 %v222_v0, %v244_v16 }
  0x4f   : > { %v247_v19 = vmul.f32 1.442695, %v246_v18  ;;  %v279_v26 = vcombine.high %v246_v18, %v246_v18  ;;  %v281_v28 = vsel %vm276_vm1, %v246_v18, 0.0 }
  0x50   : > { %v283_v34 = vsel %vm227_vm0, %v281_v28, 0.0 }
  0x51   : > { %574 = vpow2.f32 %v247_v19  ;;  %v282_v32 = vsel %vm277_vm2, %v279_v26, 0.0  ;;  %v284_v40 = vrot.slane %v283_v34, 4 }
  0x52   : > { %v290_v37 = vsel %vm227_vm0, %v282_v32, 0.0 }
  0x53   : > { %v291_v43 = vrot.slane %v290_v37, 4  ;;  %v285_v46 = vadd.f32 %v284_v40, %v283_v34 }
  0x55   : > { %v292_v49 = vadd.f32 %v291_v43, %v290_v37  ;;  %v286_v51 = vrot.slane %v285_v46, 2 }
  0x57   : > { %v293_v52 = vrot.slane %v292_v49, 2  ;;  %v287_v53 = vadd.f32 %v286_v51, %v285_v46 }
  0x59   : > { %v294_v54 = vadd.f32 %v293_v52, %v292_v49  ;;  %v288_v55 = vrot.slane %v287_v53, 1 }
  0x5b   : > { %v295_v56 = vrot.slane %v294_v54, 1  ;;  %v289_v57 = vadd.f32 %v288_v55, %v287_v53 }
  0x5d   : > { %v296_v59 = vadd.f32 %v295_v56, %v294_v54 }
  0x5e   : > { %v575_v27 = vpop.eup %574 }
  0x5f   : > { %v250_v29 = vcombine.high %v575_v27, %v575_v27  ;;  %v252_v30 = vsel %vm227_vm0, %v575_v27, 0.0 }
  0x60   : > { %v253_v31 = vrot.slane %v252_v30, 4 }
  0x61   : > { %v259_v33 = vsel %vm227_vm0, %v250_v29, 0.0 }
  0x62   : > { %v254_v35 = vadd.f32 %v253_v31, %v252_v30  ;;  %v260_v36 = vrot.slane %v259_v33, 4 }
  0x64   : > { %v255_v38 = vrot.slane %v254_v35, 2  ;;  %v261_v39 = vadd.f32 %v260_v36, %v259_v33 }
  0x66   : > { %v256_v41 = vadd.f32 %v255_v38, %v254_v35  ;;  %v262_v42 = vrot.slane %v261_v39, 2 }
  0x68   : > { %v257_v44 = vrot.slane %v256_v41, 1  ;;  %v263_v45 = vadd.f32 %v262_v42, %v261_v39 }
  0x6a   : > { %v258_v47 = vadd.f32 %v257_v44, %v256_v41  ;;  %v264_v48 = vrot.slane %v263_v45, 1 }
  0x6c   : > { %v265_v50 = vadd.f32 %v264_v48, %v263_v45  ;;  %576 = vlog2.f32 %v258_v47 }
  0x6e   : > { %578 = vlog2.f32 %v265_v50 }
  0x79   : > { %v577_v58 = vpop.eup %576 }
  0x7a   : > { %v298_v60 = vmul.f32 0.6931472, %v577_v58 }
  0x7b   : > { %v579_v61 = vpop.eup %578 }
  0x7c   : > { %v300_v62 = vmul.f32 0.6931472, %v579_v61  ;;  %v301_v63 = vsub.f32 %v289_v57, %v298_v60 }
  0x7e   : > { %v302_v0 = vsub.f32 %v296_v59, %v300_v62  ;;  %v303_v1 = vmul.f32 1.442695, %v301_v63 }
  0x80   : > { %580 = vpow2.f32 %v303_v1  ;;  %v305_v2 = vmul.f32 1.442695, %v302_v0 }
  0x82   : > { %582 = vpow2.f32 %v305_v2 }
  0x8d   : > { %v581_v5 = vpop.eup %580 }
  0x8e   : > { %v307_v6 = vsub.f32 1.0, %v581_v5 }
  0x8f   : > { %v583_v7 = vpop.eup %582 }
  0x90   : > { %v308_v8 = vsub.f32 1.0, %v583_v7  ;;  %v309_v9 = vmul.f32 %v307_v6, %v307_v6 }
  0x92   : > { %v310_v11 = vmul.f32 %v308_v8, %v308_v8  ;;  %v312_v12 = vmul.f32 %v309_v9, %v301_v63 }
  0x94   : > { %v313_v13 = vmul.f32 %v310_v11, %v302_v0 }
  0x96   : > { %v316_v15 = vcombine.low %v312_v12, %v313_v13 }
  0x98   : > { %v323_v16 = vrot.slane %v316_v15, %v322_v14 }
  0x9a   : > { %v330_v17 = vrot.slane %v323_v16, %v322_v14 }
  0x9c   : > { %v332_v18 = vsel %vm311_vm3, %v330_v17, 0.0 }
  0x9d   : > { %v337_v19 = vrot.slane %v332_v18, %v270_v21  ;;  %v341_v24 = vrot.slane %v332_v18, %v274_v23 }
  0x9f   : > { %v345_v25 = vsel %vm344_vm4, %v337_v19, 0.0  ;;  %v346_v26 = vsel %vm344_vm4, %v341_v24, 0.0 }
  0xa0   : > { %v347_v27 = vadd.f32 %v346_v26, %v345_v25 }
  0xa2   : > { %348 = vadd.xlane.f32.xlu0 %v347_v27 }
 0x12b   : > { %v349_v28 = vpop.xlane.xlu0 %348 }
 0x12c   : > { %v350_v29 = vrot.slane %v349_v28, 4 }
 0x12e   : > { %v351_v30 = vadd.f32 %v350_v29, %v349_v28 }
 0x130   : > { %v352_v22 = vrot.slane %v351_v30, 2 }
 0x132   : > { %v353_v31 = vadd.f32 %v352_v22, %v351_v30 }
 0x134   : > { %v354_v32 = vrot.slane %v353_v31, 1 }
 0x136   : > { %v355_v33 = vadd.f32 %v354_v32, %v353_v31 }
 0x138   : > { %503 = vpush %v355_v33 }
 0x169   : > { %s504_s28 = spop %503 }
 0x16a   : > { %s357_s29 = ssub.f32 0.0, %s504_s28 }
 0x16c   : > { %v358_v20 = vstv %s357_s29 }
 0x16d   : > { %359 = vst [vmem:[%s219_s21] sm:$0xff] %v358_v20 }
 0x16e   : > { %653 = shalt.err (!%p650_p6)
}
 0x16f   : > { %s654_s16 = scalar_lea.hbm %s903_s8, 128  ;;  %s658_s5 = scalar_lea.hbm %s947_s2, 256 }
 0x170   : > { %p655_p7 = scmp.ne.s32.totalorder %s903_s8, %s654_s16  ;;  %p659_p4 = scmp.lt.s32.totalorder %s903_s8, %s947_s2 }
 0x171   : > { %p660_p10 = scmp.lt.s32.totalorder %s658_s5, %s654_s16 }
 0x172   : > { %p656_p1 = pnand %p655_p7, %p796_p9 }
 0x173   : > { %p661_p8 = por %p660_p10, %p659_p4 }
 0x174   : > { %p657_p2 = pneg %p656_p1 }
 0x176   : > { %p662_p0 = pnand %p661_p8, %p657_p2 }
 0x178   : > { %665 = shalt.err (!%p662_p0)
}
 0x179   : > { %509 = dma.vmem_to_hbm [thread:$0]  (%p796_p9), %s376_s26, 128, %s903_s8, %s361_s30  }
 0x17a PF: > { %s387_s21 = sand.u32 1, %s704_s9   ;;  %p954_p3 = scmp.ge.s32.totalorder %s724_s14, 2 }
 0x17b   : > { %s388_s27 = scalar_lea.sflag [#allocation4], %s387_s21 }
 0x17c   : > { %p519_p13 = pnand %p954_p3, %p803_p11 }
 0x17e   : > { %p520_p5 = pneg %p519_p13 }
 0x180   : > { %699 = dma.done.wait (%p520_p5), %s388_s27, 128  }
 0x181   : > { %701 = vsyncadd (%p520_p5), %s388_s27, 4294967168  ;;  %s21_s14 = sadd.s32 1, %s724_s14   ;;  %s955_s9 = smov %s708_s10 }
 0x182   : > { %p18_p12 = scmp.ge.s32.totalorder %s21_s14, 4   ;;  %s956_s10 = smov %s712_s11 }
 0x183   : > { %s957_s11 = smov %s801_s23  ;;  %s958_s12 = smov %s720_s13 }
 0x184   : > { %s959_s13 = smov %s961_s17  ;;  %20 = sbr.rel (!%p18_p12) target bundleno = 8 (0x8), region = 86 }
 0x189   :  { %393 = vsyncpa [#allocation3], 1 }
 0x18a   :  { %395 = vsyncpa [#allocation3 + $0x1], 1 }
 0x18b   :  { %396 = vsyncpa [#allocation6], 1 }
 0x18c   :  { %398 = vsyncpa [#allocation6 + $0x1], 1 }
 0x18d   :  { %399 = vsyncpa [#allocation4], 1 }
 0x18e   :  { %401 = vsyncpa [#allocation4 + $0x1], 1 }

</bundles_post_ra>
